<compile_context>
chip_gen: v6e
topology: v6e:2x2x1
jax: 0.10.0
libtpu: 0.0.40
codegen_flags: <defaults>
</compile_context>

<pallas_src>
import jax
import jax.numpy as jnp
from jax.experimental import pallas as pl
from jax.experimental.pallas import tpu as pltpu


# ----------- fused adaLN (SiLU->Linear) + LayerNorm + modulate + Linear -----------
def final_layer_kernel(x_ref, c_ref, wa_ref, ba_ref, wl_ref, bl_ref, out_ref):
    H = x_ref.shape[-1]

    # ---- adaLN modulation: (shift, scale) = SiLU(c) @ W_ada + b_ada ----
    # Tiny (1,H)x(H,2H) matmul; recomputed per tile so there is no cross-tile
    # carry and both grid axes stay "parallel".
    c = c_ref[0].astype(jnp.float32)                          # (1, H)
    silu = c * jax.nn.sigmoid(c)                              # SiLU (EUP slot)
    ss = jnp.dot(silu.astype(wa_ref.dtype), wa_ref[...],
                 preferred_element_type=jnp.float32)
    ss = ss + ba_ref[...].astype(jnp.float32)                 # (1, 2H)
    shift = ss[:, :H]                                         # static slices
    scale1 = 1.0 + ss[:, H:]                                  # (1, H)

    # ---- LayerNorm (eps=1e-6, no affine) fused with the modulate scale ----
    x = x_ref[0].astype(jnp.float32)                          # (tT, H)
    mean = jnp.mean(x, axis=-1, keepdims=True)
    xc = x - mean
    var = jnp.mean(xc * xc, axis=-1, keepdims=True)           # biased var (PyTorch LN)
    rinv = jax.lax.rsqrt(var + 1e-6)                          # EUP slot
    y = xc * (rinv * scale1) + shift                          # (tT, H)

    # ---- final Linear: lane-dense output (O padded to a multiple of 128) ----
    out = jnp.dot(y.astype(wl_ref.dtype), wl_ref[...],
                  preferred_element_type=jnp.float32)         # (tT, O_pad)
    out_ref[0] = (out + bl_ref[...].astype(jnp.float32)).astype(out_ref.dtype)


def final_layer(x, c, w_ada, b_ada, w_lin, b_lin, *,
                block_t=512, vmem_limit_bytes=None):
    """x: (B,T,H), c: (B,H), w_ada: (H,2H), b_ada: (2H,), w_lin: (H,O), b_lin: (O,).
    Returns (B,T,O) in x.dtype.  block_t: token tile size (default keeps tiles
    well inside v7x's 64 MiB VMEM; raise vmem_limit_bytes for bigger tiles on
    v5e/v6e)."""
    B, T, H = x.shape
    O = w_lin.shape[1]
    out_dtype = x.dtype

    # --- lane-dense output: zero-pad O up to a multiple of 128 lanes ---
    O_pad = max(128, ((O + 127) // 128) * 128)
    if O_pad != O:
        w_lin = jnp.pad(w_lin, ((0, 0), (0, O_pad - O)))
        b_lin = jnp.pad(b_lin, ((0, O_pad - O),))

    # --- tile the token axis (multiple of the sublane count for x.dtype) ---
    sub = max(8, 32 // jnp.dtype(x.dtype).itemsize)           # 8 f32 / 16 bf16
    tT = max(sub, ((min(block_t, T) + sub - 1) // sub) * sub)
    T_pad = ((T + tT - 1) // tT) * tT
    if T_pad != T:
        # zero rows are LN-safe (mean=var=0 -> finite) and sliced off below
        x = jnp.pad(x, ((0, 0), (0, T_pad - T), (0, 0)))
    nT = T_pad // tT

    c3 = c.reshape(B, 1, H)
    b_ada2 = b_ada.reshape(1, 2 * H)
    b_lin2 = b_lin.reshape(1, O_pad)

    isz = lambda a: jnp.dtype(a.dtype).itemsize
    cost = pl.CostEstimate(
        flops=2 * B * T_pad * H * O_pad + 2 * B * nT * H * 2 * H,
        transcendentals=B * T_pad + B * nT * H,               # rsqrt + sigmoid
        bytes_accessed=(x.size * isz(x) + c.size * isz(c)
                        + w_ada.size * isz(w_ada) + b_ada.size * isz(b_ada)
                        + w_lin.size * isz(w_lin) + b_lin.size * isz(b_lin)
                        + B * T_pad * O_pad * jnp.dtype(out_dtype).itemsize),
    )

    out = pl.pallas_call(
        final_layer_kernel,
        out_shape=jax.ShapeDtypeStruct((B, T_pad, O_pad), out_dtype),
        grid=(B, nT),                                         # B outer, T-tiles inner
        in_specs=[
            pl.BlockSpec((1, tT, H), lambda b, t: (b, t, 0)),     # x tile (pipelined)
            pl.BlockSpec((1, 1, H), lambda b, t: (b, 0, 0)),      # c row
            pl.BlockSpec((H, 2 * H), lambda b, t: (0, 0)),        # adaLN W (resident)
            pl.BlockSpec((1, 2 * H), lambda b, t: (0, 0)),        # adaLN b (resident)
            pl.BlockSpec((H, O_pad), lambda b, t: (0, 0)),        # final W (resident)
            pl.BlockSpec((1, O_pad), lambda b, t: (0, 0)),        # final b (resident)
        ],
        out_specs=pl.BlockSpec((1, tT, O_pad), lambda b, t: (b, t, 0)),
        compiler_params=pltpu.CompilerParams(
            dimension_semantics=("parallel", "parallel"),
            vmem_limit_bytes=vmem_limit_bytes,
        ),
        cost_estimate=cost,
    )(x, c3, w_ada, b_ada2, w_lin, b_lin2)

    if T_pad != T or O_pad != O:
        out = out[:, :T, :O]
    return out


# --------------------------- pure-JAX reference -------------------------------
def final_layer_ref(x, c, w_ada, b_ada, w_lin, b_lin):
    H = x.shape[-1]
    silu = c * jax.nn.sigmoid(c)
    ss = silu @ w_ada + b_ada
    shift, scale = ss[:, :H], ss[:, H:]
    mean = x.mean(-1, keepdims=True)
    var = ((x - mean) ** 2).mean(-1, keepdims=True)
    xn = (x - mean) / jnp.sqrt(var + 1e-6)
    y = xn * (1 + scale[:, None, :]) + shift[:, None, :]
    return y @ w_lin + b_lin


if __name__ == "__main__":
    # Small forward-consistent shapes: hidden=32, patch=(2,2), out_channels=4
    B, T, H = 2, 12, 32
    P0, P1, C_OUT = 2, 2, 4
    O = P0 * P1 * C_OUT  # 16

    key = jax.random.PRNGKey(0)
    kx, kc, kwa, kba, kwl, kbl = jax.random.split(key, 6)

    x = jax.random.normal(kx, (B, T, H), dtype=jnp.float32)
    c = jax.random.normal(kc, (B, H), dtype=jnp.float32)

    # Deterministic synthetic parameters (stored already transposed: (in, out))
    w_ada = jax.random.normal(kwa, (H, 2 * H), dtype=jnp.float32) * 0.05
    b_ada = jax.random.normal(kba, (2 * H,), dtype=jnp.float32) * 0.05
    w_lin = jax.random.normal(kwl, (H, O), dtype=jnp.float32) * 0.05
    b_lin = jax.random.normal(kbl, (O,), dtype=jnp.float32) * 0.05

    ref = final_layer_ref(x, c, w_ada, b_ada, w_lin, b_lin)

    # f32, single token tile
    out = jax.block_until_ready(final_layer(x, c, w_ada, b_ada, w_lin, b_lin))
    assert out.shape == (B, T, O), out.shape
    assert jnp.allclose(out, ref, rtol=1e-4, atol=1e-4), "f32 mismatch vs reference"

    # f32, multiple token tiles with a ragged (padded) last tile
    out_tiled = jax.block_until_ready(
        final_layer(x, c, w_ada, b_ada, w_lin, b_lin, block_t=8))
    assert jnp.allclose(out_tiled, ref, rtol=1e-4, atol=1e-4), "tiled mismatch"

    # bf16 activations / final weight (memory-bound path, loose tolerance)
    out_bf16 = jax.block_until_ready(
        final_layer(x.astype(jnp.bfloat16), c, w_ada, b_ada,
                    w_lin.astype(jnp.bfloat16), b_lin))
    assert out_bf16.dtype == jnp.bfloat16
    assert jnp.allclose(out_bf16.astype(jnp.float32), ref, rtol=5e-2, atol=5e-2), \
        "bf16 mismatch vs reference"

    print("KERNEL_OK")
</pallas_src>

<mosaic_0001>
module attributes {stable_mosaic.version = 11 : i64} {
  func.func @final_layer_kernel(%arg0: i32, %arg1: i32, %arg2: memref<1x16x32xf32, #tpu.memory_space<vmem>>, %arg3: memref<1x1x32xf32, #tpu.memory_space<vmem>>, %arg4: memref<32x64xf32, #tpu.memory_space<vmem>>, %arg5: memref<1x64xf32, #tpu.memory_space<vmem>>, %arg6: memref<32x128xf32, #tpu.memory_space<vmem>>, %arg7: memref<1x128xf32, #tpu.memory_space<vmem>>, %arg8: memref<1x16x128xf32, #tpu.memory_space<vmem>>) attributes {dimension_semantics = [#tpu.dimension_semantics<parallel>, #tpu.dimension_semantics<parallel>], iteration_bounds = array<i64: 2, 1>, scalar_prefetch = 0 : i64, scratch_operands = 0 : i64, tpu.core_type = #tpu.core_type<tc>, window_params = [{transform_indices = @transform_0, window_bounds = array<i64: 1, 16, 32>}, {transform_indices = @transform_1, window_bounds = array<i64: 1, 1, 32>}, {pipeline_mode = #tpu.pipeline_mode<synchronous>, transform_indices = @transform_2, window_bounds = array<i64: 32, 64>}, {pipeline_mode = #tpu.pipeline_mode<synchronous>, transform_indices = @transform_3, window_bounds = array<i64: 1, 64>}, {pipeline_mode = #tpu.pipeline_mode<synchronous>, transform_indices = @transform_4, window_bounds = array<i64: 32, 128>}, {pipeline_mode = #tpu.pipeline_mode<synchronous>, transform_indices = @transform_5, window_bounds = array<i64: 1, 128>}, {transform_indices = @transform_6, window_bounds = array<i64: 1, 16, 128>}]} {
    %c0 = arith.constant 0 : index
    %c0_0 = arith.constant 0 : index
    %c0_1 = arith.constant 0 : index
    %0 = vector.load %arg3[%c0, %c0_0, %c0_1] : memref<1x1x32xf32, #tpu.memory_space<vmem>>, vector<1x1x32xf32>
    %1 = vector.shape_cast %0 : vector<1x1x32xf32> to vector<1x32xf32>
    %2 = arith.negf %1 : vector<1x32xf32>
    %3 = math.exp %2 : vector<1x32xf32>
    %cst = arith.constant 1.000000e+00 : f32
    %4 = vector.broadcast %cst : f32 to vector<1x32xf32>
    %5 = arith.addf %4, %3 : vector<1x32xf32>
    %6 = arith.divf %4, %5 : vector<1x32xf32>
    %7 = arith.mulf %1, %6 : vector<1x32xf32>
    %c0_2 = arith.constant 0 : index
    %c0_3 = arith.constant 0 : index
    %8 = vector.load %arg4[%c0_2, %c0_3] : memref<32x64xf32, #tpu.memory_space<vmem>>, vector<32x64xf32>
    %cst_4 = arith.constant dense<0.000000e+00> : vector<1x64xf32>
    %9 = tpu.matmul %7, %8, %cst_4 {dimension_numbers = #tpu.dot_dimension_numbers<[1], [0], [0], [1], [0, 0, 1, 1], [], []>} : vector<1x32xf32>, vector<32x64xf32>, vector<1x64xf32> -> vector<1x64xf32>
    %c0_5 = arith.constant 0 : index
    %c0_6 = arith.constant 0 : index
    %10 = vector.load %arg5[%c0_5, %c0_6] : memref<1x64xf32, #tpu.memory_space<vmem>>, vector<1x64xf32>
    %11 = arith.addf %9, %10 : vector<1x64xf32>
    %12 = vector.extract_strided_slice %11 {offsets = [0, 0], sizes = [1, 32], strides = [1, 1]} : vector<1x64xf32> to vector<1x32xf32>
    %13 = vector.extract_strided_slice %11 {offsets = [0, 32], sizes = [1, 32], strides = [1, 1]} : vector<1x64xf32> to vector<1x32xf32>
    %cst_7 = arith.constant 1.000000e+00 : f32
    %14 = vector.broadcast %cst_7 : f32 to vector<1x32xf32>
    %15 = arith.addf %14, %13 : vector<1x32xf32>
    %c0_8 = arith.constant 0 : index
    %c0_9 = arith.constant 0 : index
    %c0_10 = arith.constant 0 : index
    %16 = vector.load %arg2[%c0_8, %c0_9, %c0_10] : memref<1x16x32xf32, #tpu.memory_space<vmem>>, vector<1x16x32xf32>
    %17 = vector.shape_cast %16 : vector<1x16x32xf32> to vector<16x32xf32>
    %cst_11 = arith.constant dense<0.000000e+00> : vector<16xf32>
    %18 = vector.multi_reduction <add>, %17, %cst_11 [1] : vector<16x32xf32> to vector<16xf32>
    %19 = vector.shape_cast %18 : vector<16xf32> to vector<16x1xf32>
    %cst_12 = arith.constant 3.200000e+01 : f32
    %20 = vector.broadcast %cst_12 : f32 to vector<16x1xf32>
    %21 = arith.divf %19, %20 : vector<16x1xf32>
    %22 = vector.broadcast %21 : vector<16x1xf32> to vector<16x32xf32>
    %23 = arith.subf %17, %22 : vector<16x32xf32>
    %24 = arith.mulf %23, %23 : vector<16x32xf32>
    %cst_13 = arith.constant dense<0.000000e+00> : vector<16xf32>
    %25 = vector.multi_reduction <add>, %24, %cst_13 [1] : vector<16x32xf32> to vector<16xf32>
    %26 = vector.shape_cast %25 : vector<16xf32> to vector<16x1xf32>
    %cst_14 = arith.constant 3.200000e+01 : f32
    %27 = vector.broadcast %cst_14 : f32 to vector<16x1xf32>
    %28 = arith.divf %26, %27 : vector<16x1xf32>
    %cst_15 = arith.constant 9.99999997E-7 : f32
    %29 = vector.broadcast %cst_15 : f32 to vector<16x1xf32>
    %30 = arith.addf %28, %29 : vector<16x1xf32>
    %31 = math.rsqrt %30 : vector<16x1xf32>
    %32 = vector.broadcast %31 : vector<16x1xf32> to vector<16x32xf32>
    %33 = vector.broadcast %15 : vector<1x32xf32> to vector<16x32xf32>
    %34 = arith.mulf %32, %33 : vector<16x32xf32>
    %35 = arith.mulf %23, %34 : vector<16x32xf32>
    %36 = vector.broadcast %12 : vector<1x32xf32> to vector<16x32xf32>
    %37 = arith.addf %35, %36 : vector<16x32xf32>
    %c0_16 = arith.constant 0 : index
    %c0_17 = arith.constant 0 : index
    %38 = vector.load %arg6[%c0_16, %c0_17] : memref<32x128xf32, #tpu.memory_space<vmem>>, vector<32x128xf32>
    %cst_18 = arith.constant dense<0.000000e+00> : vector<16x128xf32>
    %39 = tpu.matmul %37, %38, %cst_18 {dimension_numbers = #tpu.dot_dimension_numbers<[1], [0], [0], [1], [0, 0, 1, 1], [], []>} : vector<16x32xf32>, vector<32x128xf32>, vector<16x128xf32> -> vector<16x128xf32>
    %c0_19 = arith.constant 0 : index
    %c0_20 = arith.constant 0 : index
    %40 = vector.load %arg7[%c0_19, %c0_20] : memref<1x128xf32, #tpu.memory_space<vmem>>, vector<1x128xf32>
    %41 = vector.broadcast %40 : vector<1x128xf32> to vector<16x128xf32>
    %42 = arith.addf %39, %41 : vector<16x128xf32>
    %c0_21 = arith.constant 0 : index
    %c0_22 = arith.constant 0 : index
    %c0_23 = arith.constant 0 : index
    %43 = vector.load %arg8[%c0_21, %c0_22, %c0_23] : memref<1x16x128xf32, #tpu.memory_space<vmem>>, vector<1x16x128xf32>
    %44 = vector.shape_cast %43 : vector<1x16x128xf32> to vector<16x128xf32>
    %45 = vector.shape_cast %42 : vector<16x128xf32> to vector<1x16x128xf32>
    tpu.vector_store %arg8[%c0_21, %c0_22, %c0_23], %45 {strides = array<i32>} : memref<1x16x128xf32, #tpu.memory_space<vmem>>, vector<1x16x128xf32>,
    return
  }
  func.func @transform_0(%arg0: i32, %arg1: i32) -> (i32, i32, i32) {
    %c0_i32 = arith.constant 0 : i32
    %c0_i32_0 = arith.constant 0 : i32
    return %arg0, %arg1, %c0_i32 : i32, i32, i32
  }
  func.func @transform_1(%arg0: i32, %arg1: i32) -> (i32, i32, i32) {
    %c0_i32 = arith.constant 0 : i32
    %c0_i32_0 = arith.constant 0 : i32
    %c0_i32_1 = arith.constant 0 : i32
    return %arg0, %c0_i32, %c0_i32_0 : i32, i32, i32
  }
  func.func @transform_2(%arg0: i32, %arg1: i32) -> (i32, i32) {
    %c0_i32 = arith.constant 0 : i32
    %c0_i32_0 = arith.constant 0 : i32
    %c0_i32_1 = arith.constant 0 : i32
    return %c0_i32, %c0_i32_0 : i32, i32
  }
  func.func @transform_3(%arg0: i32, %arg1: i32) -> (i32, i32) {
    %c0_i32 = arith.constant 0 : i32
    %c0_i32_0 = arith.constant 0 : i32
    %c0_i32_1 = arith.constant 0 : i32
    return %c0_i32, %c0_i32_0 : i32, i32
  }
  func.func @transform_4(%arg0: i32, %arg1: i32) -> (i32, i32) {
    %c0_i32 = arith.constant 0 : i32
    %c0_i32_0 = arith.constant 0 : i32
    %c0_i32_1 = arith.constant 0 : i32
    return %c0_i32, %c0_i32_0 : i32, i32
  }
  func.func @transform_5(%arg0: i32, %arg1: i32) -> (i32, i32) {
    %c0_i32 = arith.constant 0 : i32
    %c0_i32_0 = arith.constant 0 : i32
    %c0_i32_1 = arith.constant 0 : i32
    return %c0_i32, %c0_i32_0 : i32, i32
  }
  func.func @transform_6(%arg0: i32, %arg1: i32) -> (i32, i32, i32) {
    %c0_i32 = arith.constant 0 : i32
    %c0_i32_0 = arith.constant 0 : i32
    return %arg0, %arg1, %c0_i32 : i32, i32, i32
  }
}

</mosaic_0001>

<bundles_post_ra>
// kernel: tpu_custom_call.1
= control target key start
LH: loop header
LB: loop body
LE: loop exit
PB: predicated region body
PF: predicated region fallthrough
CT: control target
= control target key end

     0   :  { %s1376_s0 = inlined_call_operand.hbm [shape: f32[2,16,32], index: 0, kind: input, shape index: {}]   ;;  %s1377_s1 = inlined_call_operand.hbm [shape: f32[2,1,32], index: 1, kind: input, shape index: {}]   ;;  %s1378_s2 = inlined_call_operand.hbm [shape: f32[32,64], index: 2, kind: input, shape index: {}]   ;;  %s1379_s3 = inlined_call_operand.vmem [shape: f32[1,64], index: 3, kind: input, shape index: {}]   ;;  %s1380_s4 = inlined_call_operand.hbm [shape: f32[32,128], index: 4, kind: input, shape index: {}]   ;;  %s1381_s5 = inlined_call_operand.vmem [shape: f32[1,128], index: 5, kind: input, shape index: {}]   ;;  %s1382_s6 = inlined_call_operand.hbm [shape: f32[2,16,128], index: 6, kind: output, shape index: {}]  }
   0x1   :  { %1390 = sst [smem:[#allocation21_spill]] %s1376_s0 }
   0x2   :  { %1391 = sst [smem:[#allocation22_spill]] %s1378_s2 }
   0x3   :  { %1392 = sst [smem:[#allocation23_spill]] %s1380_s4 }
   0x4   :  { %11 = vsyncpa [#allocation3], 0 }
   0x5   :  { %13 = vsyncpa [#allocation3 + $0x1], 0 }
   0x6   :  { %14 = vsyncpa [#allocation6], 0 }
   0x7   :  { %16 = vsyncpa [#allocation6 + $0x1], 0 }
   0x8   :  { %17 = vsyncpa [#allocation9], 0 }
   0x9   :  { %18 = vsyncpa [#allocation4], 0 }
   0xa   :  { %20 = vsyncpa [#allocation4 + $0x1], 0  ;;  %s1138_s21 = smov 0   ;;  %s1140_s22 = smov 0  }
   0xb   :  { %s1142_s23 = smov 0   ;;  %s1144_s24 = smov 0  }
   0xc   :  { %s1146_s25 = smov 0   ;;  %s1148_s26 = smov 0  }
   0xd LB: > { %1393 = sst [smem:[#allocation16_spill]] %s1077_s23  ;;  %s1169_s27 = sadd.s32 4294967295, %s1089_s26   ;;  %s1089_s26 = sphi %s1148_s26, %s26_s26   ;;  %s1085_s25 = sphi %s1146_s25, %s1418_s25   ;;  %s1081_s24 = sphi %s1144_s24, %s1417_s24   ;;  %s1077_s23 = sphi %s1142_s23, %s1413_s23   ;;  %s1073_s22 = sphi %s1140_s22, %s1416_s22   ;;  %s1069_s21 = sphi %s1138_s21, %s1415_s21  }
   0xe   : > { %1394 = sst [smem:[#allocation17_spill]] %s1089_s26  ;;  %s727_s28 = sadd.s32 4294967294, %s1089_s26  }
   0xf   : > { %p60_p0 = scmp.ne.s32.totalorder %s1073_s22, %s1069_s21  ;;  %p61_p1 = scmp.eq.s32.totalorder %s1169_s27, 0 }
  0x10   : > { %p196_p2 = scmp.eq.s32.totalorder %s1169_s27, 1  ;;  %p202_p3 = scmp.eq.s32.totalorder %s727_s28, 1 }
  0x11   : > { %p1178_p4 = por %p61_p1, %p60_p0  ;;  %p728_p5 = scmp.ge.s32.totalorder %s1089_s26, 1 }
  0x12   : > { %p1183_p6 = por %p202_p3, %p60_p0  ;;  %p209_p7 = scmp.lt.s32.totalorder %s1089_s26, 3 }
  0x13   : > { %s1091_s8 = smov [#allocation7]   ;;  %s1092_s11 = smov [#allocation8]  }
  0x14   : > { %s1396_s30 = scalar_select %p1183_p6, 1, 0 }
  0x15   : > { %p1188_p8 = pnand %p728_p5, %p209_p7  ;;  %s221_s9 = sshll.u32 %s1091_s8, 4  ;;  %s222_s9 = int_to_ptr.vmem [resolvable:$true] %s221_s9 }
  0x16   : > { %1397 = sst [smem:[#allocation18_spill]] %s1396_s30  ;;  %s237_s12 = sshll.u32 %s1092_s11, 4  ;;  %s238_s12 = int_to_ptr.vmem [resolvable:$true] %s237_s12 }
  0x17   : > { %p800_p9 = pneg %p1188_p8  ;;  %s900_s13 = scalar_lea.vmem %s222_s9, 512 }
  0x18   : > { %p901_p13 = scmp.ne.s32.totalorder %s222_s9, %s900_s13  ;;  %p908_p5 = scmp.lt.s32.totalorder %s222_s9, %s222_s9 }
  0x19   : > { %p1197_p11 = pnand %p800_p9, %p61_p1  ;;  %p909_p7 = scmp.lt.s32.totalorder %s900_s13, %s900_s13 }
  0x1b   : > { %p891_p12 = pneg %p1197_p11  ;;  %p910_p10 = por %p909_p7, %p908_p5 }
  0x1d   : > { %p903_p0 = pnand %p901_p13, %p891_p12 }
  0x1f   : > { %p904_p3 = pneg %p903_p0 }
  0x21   : > { %p911_p9 = pnand %p910_p10, %p904_p3 }
  0x23   : > { %914 = shalt.err (!%p911_p9)
}
  0x24   : > { %s1383_s14 = smov 128   ;;  %s1384_s15 = smov 8  }
  0x25   : > { %s1400_s2 = sld [smem:[#allocation22_spill]]  ;;  %s926_s18 = scalar_lea.vmem %s238_s12, 512 }
  0x26   : > { %p927_p13 = scmp.ne.s32.totalorder %s238_s12, %s926_s18  ;;  %p934_p10 = scmp.lt.s32.totalorder %s238_s12, %s238_s12 }
  0x27   : > { %p935_p3 = scmp.lt.s32.totalorder %s926_s18, %s926_s18 }
  0x28   : > { %p929_p0 = pnand %p927_p13, %p891_p12 }
  0x29   : > { %p936_p7 = por %p935_p3, %p934_p10 }
  0x2a   : > { %p930_p5 = pneg %p929_p0 }
  0x2b   : > { %803 = dma.hbm_to_vmem [thread:$0]  (!%p1197_p11), %s1400_s2, 512, %s222_s9, [#allocation6], %s1383_s14, %s1383_s14, %s1384_s15  }
  0x2c   : > { %p937_p9 = pnand %p936_p7, %p930_p5 }
  0x2e   : > { %940 = shalt.err (!%p937_p9)
}
  0x2f   : > { %s1401_s4 = sld [smem:[#allocation23_spill]]  ;;  %s38_s28 = sadd.s32 1, %s1085_s25 }
  0x30   : > { %s47_s8 = sadd.s32 1, %s1077_s23  ;;  %p40_p12 = scmp.ge.s32.totalorder %s38_s28, 2 }
  0x31   : > { %p54_p13 = scmp.ne.s32.totalorder %s1077_s23, %s1073_s22  ;;  %p55_p0 = scmp.eq.s32.totalorder %s1089_s26, 0 }
  0x32   : > { %p820_p5 = scmp.lt.s32.totalorder %s1089_s26, 2  ;;  %s1420_s28 = smov (%p40_p12, %s38_s28), 0 }
  0x33   : > { %1402 = sst [smem:[#allocation19_spill]] %s1420_s28  ;;  %p56_p10 = por %p55_p0, %p54_p13 }
  0x34   : > { %p1235_p3 = por %p196_p2, %p54_p13  ;;  %s42_s10 = ssub.s32 %s1085_s25, %s1420_s28 }
  0x35   : > { %806 = dma.hbm_to_vmem [thread:$0]  (!%p1197_p11), %s1401_s4, 512, %s238_s12, [#allocation9], %s1383_s14, %s1383_s14, %s1384_s15  }
  0x36   : > { %s1242_s11 = sand.u32 1, %s1077_s23   ;;  %p45_p11 = scmp.eq.s32.totalorder %s42_s10, 0 }
  0x37   : > { %s732_s12 = sshll.u32 %s1242_s11, 4  ;;  %s751_s13 = sshll.u32 %s1085_s25, 8 }
  0x38   : > { %s1247_s16 = scalar_select %p45_p11, %s1077_s23, %s47_s8  }
  0x39   : > { %s1405_s0 = sld [smem:[#allocation21_spill]]  ;;  %s258_s20 = scalar_lea.vmem [#allocation2], %s732_s12 }
  0x3a   : > { %1404 = sst [smem:[#allocation20_spill]] %s1247_s16  ;;  %s267_s14 = sshll.u32 %s258_s20, 4  ;;  %s268_s14 = int_to_ptr.vmem [resolvable:$true] %s267_s14 }
  0x3b   : > { %p1254_p2 = pnand %p820_p5, %p56_p10  ;;  %s277_s2 = sand.u32 1, %s1089_s26  }
  0x3c   : > { %s255_s10 = scalar_lea.sflag [#allocation3], %s1242_s11  ;;  %s954_s8 = scalar_lea.vmem %s268_s14, 256 }
  0x3d   : > { %p943_p7 = pneg %p1254_p2  ;;  %p955_p9 = scmp.ne.s32.totalorder %s268_s14, %s954_s8 }
  0x3e   : > { %s1095_s12 = smov [#allocation2]  }
  0x3f   : > { %s266_s19 = scalar_lea.hbm %s1405_s0, %s751_s13  ;;  %p957_p12 = pnand %p955_p9, %p943_p7 }
  0x40   : > { %s959_s13 = sshll.u32 %s1095_s12, 4  ;;  %s960_s13 = int_to_ptr.vmem [resolvable:$false] %s959_s13 }
  0x41   : > { %p958_p13 = pneg %p957_p12  ;;  %s961_s17 = scalar_lea.vmem %s960_s13, 512 }
  0x42   : > { %p962_p0 = scmp.lt.s32.totalorder %s268_s14, %s960_s13  ;;  %p963_p5 = scmp.lt.s32.totalorder %s961_s17, %s954_s8 }
  0x44   : > { %p964_p10 = por %p963_p5, %p962_p0 }
  0x46   : > { %p965_p11 = pnand %p964_p10, %p958_p13 }
  0x48   : > { %968 = shalt.err (!%p965_p11)
}
  0x49   : > { %s1407_s18 = smov 8   ;;  %s1408_s20 = smov 128  }
  0x4a   : > { %810 = dma.hbm_to_vmem [thread:$0]  (!%p1254_p2), %s266_s19, 256, %s268_s14, %s255_s10, %s1408_s20, %s1408_s20, %s1407_s18  }
  0x4b   : > { %s735_s0 = sshll.u32 %s1085_s25, 4  ;;  %s280_s16 = scalar_lea.vmem [#allocation5], %s1242_s11 }
  0x4c   : > { %s285_s12 = scalar_lea.hbm %s1377_s1, %s735_s0  ;;  %s287_s13 = sshll.u32 %s280_s16, 4  ;;  %s288_s13 = int_to_ptr.vmem [resolvable:$true] %s287_s13 }
  0x4d   : > { %s278_s8 = scalar_lea.sflag [#allocation6], %s277_s2  ;;  %s982_s17 = scalar_lea.vmem %s288_s13, 16 }
  0x4e   : > { %p983_p9 = scmp.ne.s32.totalorder %s288_s13, %s982_s17  ;;  %s1096_s23 = smov [#allocation5]  }
  0x4f   : > { %s987_s26 = sshll.u32 %s1096_s23, 4  ;;  %s988_s26 = int_to_ptr.vmem [resolvable:$false] %s987_s26 }
  0x50   : > { %p985_p12 = pnand %p983_p9, %p943_p7  ;;  %s989_s30 = scalar_lea.vmem %s988_s26, 32 }
  0x51   : > { %p990_p0 = scmp.lt.s32.totalorder %s288_s13, %s988_s26  ;;  %p991_p5 = scmp.lt.s32.totalorder %s989_s30, %s982_s17 }
  0x52   : > { %p986_p13 = pneg %p985_p12 }
  0x53   : > { %p992_p10 = por %p991_p5, %p990_p0 }
  0x55   : > { %p993_p11 = pnand %p992_p10, %p986_p13 }
  0x57   : > { %996 = shalt.err (!%p993_p11)
}
  0x58   : > { %813 = dma.hbm_to_vmem [thread:$0]  (!%p1254_p2), %s285_s12, 16, %s288_s13, %s278_s8  }
  0x59   : > { %296 = sbr.rel (%p1188_p8) target bundleno = 741 (0x2e5), region = 44  ;;  %s1283_s0 = sand.u32 (!%p1188_p8), 1, %s1073_s22  }
  0x5a   : > { %s737_s2 = sshll.u32 (!%p1188_p8), %s1283_s0, 4  ;;  %s299_s4 = scalar_lea.sflag (!%p1188_p8), [#allocation3], %s1283_s0 }
  0x5b   : > { %s302_s23 = scalar_lea.vmem (!%p1188_p8), [#allocation2], %s737_s2 }
  0x5e   : > { %1048 = dma.done.wait (%p1178_p4), %s299_s4, 256  }
  0x5f   : > { %1050 = vsyncadd (%p1178_p4), %s299_s4, 4294967040  ;;  %s307_s26 = sand.u32 1, %s1169_s27   ;;  %s310_s7 = scalar_lea.vmem [#allocation5], %s1283_s0 }
  0x60   : > { %s308_s30 = scalar_lea.sflag [#allocation6], %s307_s26 }
  0x61   : > { %1052 = dma.done.wait (%p1178_p4), %s308_s30, 16  }
  0x62   : > { %1054 = vsyncadd (%p1178_p4), %s308_s30, 4294967280 }
  0x63   : > { %1056 = dma.done.wait (%p61_p1), [#allocation6], 512  }
  0x64   : > { %1058 = vsyncadd (%p61_p1), [#allocation6], 4294966784 }
  0x65   : > { %1060 = dma.done.wait (%p61_p1), [#allocation9], 512  }
  0x66   : > { %1062 = vsyncadd (%p61_p1), [#allocation9], 4294966784  ;;  %v1097_v0 = vmov 0.0   ;;  %vm1098_vm0 = vmmov 0   ;;  %vm366_vm1 = vcmask 261120   ;;  %v441_v1 = vld [vmem:[%s302_s23] sm:$0xff]  ;;  %v468_v25 = vlaneseq }
  0x67   : > { %764 = vmatprep.subr.mxu0 %v1097_v0  ;;  %772 = vmatprep.mubr.msk.f32.mxu0 %vm1098_vm0, %v1097_v0  ;;  %v442_v2 = vld [vmem:[%s302_s23 + $0x8] sm:$0xff]  ;;  %v443_v4 = vsel %vm366_vm1, %v441_v1, 0.0  ;;  %v353_v7 = vld [vmem:[%s310_s7] sm:$0x1]  ;;  %s1099_s14 = smov 96   ;;  %s350_s11 = scalar_lea.vmem [#allocation10], %s737_s2 }
  0x68   : > { %v364_v3 = vld [vmem:[#allocation7 + $0x18] sm:$0xff]  ;;  %v363_v5 = vld [vmem:[#allocation7 + $0x10] sm:$0xff]  ;;  %444 = vadd.xlane.f32.xlu0 %v443_v4  ;;  %v362_v6 = vld [vmem:[#allocation7 + $0x8] sm:$0xff]  ;;  %v446_v8 = vsel %vm366_vm1, %v442_v2, 0.0  ;;  %v741_v9 = vmul.f32 -1.442695, %v353_v7 }
  0x69   : > { %765 = vmatpush3.msra.mxu0 %v364_v3  ;;  %v361_v10 = vld [vmem:[#allocation7] sm:$0xff]  ;;  %v469_v26 = vshrl.u32 %v468_v25, 7  ;;  %v365_v27 = vld [vmem:[%s1379_s3] sm:$0x1]  ;;  %v492_v40 = vld [vmem:[#allocation8 + $0x10] sm:$0xff]  ;;  %s600_s16 = sshll.u32 %s350_s11, 4  ;;  %s1323_s16 = int_to_ptr.vmem [resolvable:$true] %s600_s16 }
  0x6a   : > { %766 = vmatprep.subr.mxu0 %v1097_v0  ;;  %881 = vpow2.f32 %v741_v9  ;;  %v493_v39 = vld [vmem:[#allocation8 + $0x18] sm:$0xff]  ;;  %v491_v42 = vld [vmem:[#allocation8 + $0x8] sm:$0xff]  ;;  %v490_v43 = vld [vmem:[#allocation8] sm:$0xff]  ;;  %s752_s19 = sshll.u32 %s1081_s24, 8  ;;  %s585_s12 = scalar_lea.sflag [#allocation4], %s1283_s0 }
  0x6b   : > { %767 = vmatpush3.msra.mxu0 %v363_v5  ;;  %v470_v28 = vsub.s32 0, %v469_v26  ;;  %775 = vmatprep.subr.mxu1 %v493_v39  ;;  %v743_v55 = vld [vmem:[%s1381_s5] ss:$0 sm:$0xff]  ;;  %s1328_s20 = scalar_lea.hbm %s1382_s6, %s752_s19  ;;  %s997_s13 = scalar_lea.vmem %s1323_s16, 256 }
  0x6c   : > { %768 = vmatprep.subr.mxu0 %v1097_v0  ;;  %447 = vadd.xlane.f32.xlu0 %v446_v8  ;;  %p998_p1 = scmp.ne.s32.totalorder %s1323_s16, %s997_s13  ;;  %s1100_s24 = smov [#allocation10]  }
  0x6d   : > { %769 = vmatpush3.msra.mxu0 %v362_v6  ;;  %776 = vmatpush3.msra.mxu1 %v493_v39  ;;  %s1001_s8 = sshll.u32 %s1100_s24, 4  ;;  %s1002_s8 = int_to_ptr.vmem [resolvable:$false] %s1001_s8 }
  0x6e   : > { %770 = vmatprep.subr.mxu0 %v1097_v0  ;;  %777 = vmatprep.subr.mxu1 %v492_v40  ;;  %p999_p4 = pnand %p998_p1, %p1235_p3  ;;  %s1003_s17 = scalar_lea.vmem %s1002_s8, 512 }
  0x6f   : > { %771 = vmatpush3.msra.mxu0 %v361_v10  ;;  %778 = vmatpush3.msra.mxu1 %v492_v40  ;;  %p1004_p2 = scmp.lt.s32.totalorder %s1323_s16, %s1002_s8  ;;  %p1005_p7 = scmp.lt.s32.totalorder %s1003_s17, %s997_s13 }
  0x70   : > { %779 = vmatprep.subr.mxu1 %v491_v42  ;;  %p1000_p8 = pneg %p999_p4 }
  0x71   : > { %780 = vmatpush3.msra.mxu1 %v491_v42  ;;  %p1006_p9 = por %p1005_p7, %p1004_p2 }
  0x72   : > { %781 = vmatprep.subr.mxu1 %v490_v43 }
  0x73   : > { %782 = vmatpush3.msra.mxu1 %v490_v43  ;;  %p1007_p12 = pnand %p1006_p9, %p1000_p8 }
  0x77   : > { %v882_v11 = vpop.eup %881 }
  0x78   : > { %v357_v12 = vadd.f32 1.0, %v882_v11 }
  0x7a   : > { %883 = vrcp.f32 %v357_v12 }
  0x87   : > { %v884_v13 = vpop.eup %883 }
  0x88   : > { %v360_v14 = vmul.f32 %v884_v13, %v353_v7 }
  0x8a   : > { %773 = vmatmul.mubr.msk.f32.vlgmr.msra.gmra.mxu0 %vm366_vm1, %v360_v14 }
  0xf1   : > { %v445_v15 = vpop.xlane.xlu0 %444 }
  0xf2   : > { %v450_v16 = vmul.f32 0.03125, %v445_v15 }
  0xf4   : > { %v452_v17 = vsub.f32 %v441_v1, %v450_v16 }
  0xf5   : > { %v448_v18 = vpop.xlane.xlu0 %447 }
  0xf6   : > { %v451_v19 = vmul.f32 0.03125, %v448_v18  ;;  %v454_v20 = vmul.f32 %v452_v17, %v452_v17 }
  0xf8   : > { %v453_v21 = vsub.f32 %v442_v2, %v451_v19  ;;  %v456_v22 = vsel %vm366_vm1, %v454_v20, 0.0 }
  0xf9   : > { %457 = vadd.xlane.f32.xlu1 %v456_v22 }
  0xfa   : > { %v455_v23 = vmul.f32 %v453_v21, %v453_v21 }
  0xfc   : > { %v459_v24 = vsel %vm366_vm1, %v455_v23, 0.0 }
  0xfd   : > { %460 = vadd.xlane.f32.xlu1 %v459_v24 }
 0x14a   : > { %v436_v29 = vpop.f32.mrf.mxu0 }
 0x14b   : > { %v437_v30 = vadd.f32 %v436_v29, %v365_v27 }
 0x14c   : > { %v774_v31 = vpop.f32.mrf.mxu0 }
 0x14d   : > { %v487_v32 = vrot.slane %v437_v30, %v470_v28  ;;  %v440_v41 = vadd.f32 1.0, %v437_v30 }
 0x14f   : > { %v471_v44 = vrot.slane %v440_v41, %v470_v28 }
 0x182   : > { %v458_v33 = vpop.xlane.xlu1 %457 }
 0x183   : > { %v462_v34 = vmul.f32 0.03125, %v458_v33 }
 0x185   : > { %v464_v35 = vadd.f32 1e-06, %v462_v34 }
 0x186   : > { %v461_v36 = vpop.xlane.xlu1 %460 }
 0x187   : > { %885 = vrsqrt.f32 %v464_v35  ;;  %v463_v37 = vmul.f32 0.03125, %v461_v36 }
 0x189   : > { %v465_v38 = vadd.f32 1e-06, %v463_v37 }
 0x18b   : > { %887 = vrsqrt.f32 %v465_v38 }
 0x194   : > { %v886_v45 = vpop.eup %885 }
 0x195   : > { %v472_v46 = vmul.f32 %v886_v45, %v471_v44 }
 0x197   : > { %476 = vrot.lane.b32.xlu0 %v472_v46, %s1099_s14 }
 0x198   : > { %v888_v47 = vpop.eup %887 }
 0x199   : > { %v473_v48 = vmul.f32 %v888_v47, %v471_v44 }
 0x19b   : > { %478 = vrot.lane.b32.xlu1 %v473_v48, %s1099_s14 }
 0x209   : > { %v477_v49 = vpop.permute.xlu0 %476 }
 0x20a   : > { %v482_v50 = vmul.f32 %v477_v49, %v452_v17 }
 0x20c   : > { %v488_v51 = vadd.f32 %v487_v32, %v482_v50 }
 0x20d   : > { %v479_v52 = vpop.permute.xlu1 %478 }
 0x20e   : > { %v483_v53 = vmul.f32 %v479_v52, %v453_v21  ;;  %783 = vmatprep.mubr.msk.f32.mxu1 %vm366_vm1, %v488_v51 }
 0x210   : > { %v489_v54 = vadd.f32 %v487_v32, %v483_v53 }
 0x212   : > { %784 = vmatmul.mubr.msk.f32.vlgmr.msra.gmra.mxu1 %vm366_vm1, %v489_v54 }
 0x2d2   : > { %v785_v56 = vpop.f32.mrf.mxu1 }
 0x2d3   : > { %v579_v57 = vadd.f32 %v785_v56, %v743_v55 }
 0x2d4   : > { %v573_v58 = vpop.f32.mrf.mxu1 }
 0x2d5   : > { %583 = vst [vmem:[%s350_s11 + $0x8] sm:$0xff] %v579_v57  ;;  %v574_v59 = vadd.f32 %v743_v55, %v573_v58 }
 0x2d7   : > { %582 = vst [vmem:[%s350_s11] sm:$0xff] %v574_v59 }
 0x2d8   : > { %1010 = shalt.err (!%p1007_p12)
}
 0x2d9   : > { %s1011_s2 = scalar_lea.hbm %s1328_s20, 256  ;;  %s1015_s26 = scalar_lea.hbm %s1382_s6, 512 }
 0x2da   : > { %p1012_p13 = scmp.ne.s32.totalorder %s1328_s20, %s1011_s2  ;;  %p1016_p10 = scmp.lt.s32.totalorder %s1328_s20, %s1382_s6 }
 0x2db   : > { %p1017_p11 = scmp.lt.s32.totalorder %s1015_s26, %s1011_s2 }
 0x2dc   : > { %p1013_p0 = pnand %p1012_p13, %p1235_p3 }
 0x2dd   : > { %p1018_p1 = por %p1017_p11, %p1016_p10 }
 0x2de   : > { %p1014_p5 = pneg %p1013_p0 }
 0x2e0   : > { %p1019_p4 = pnand %p1018_p1, %p1014_p5 }
 0x2e2   : > { %1022 = shalt.err (!%p1019_p4)
}
 0x2e3   : > { %s1101_s27 = smov 128   ;;  %s1102_s29 = smov 8  }
 0x2e4   : > { %798 = dma.vmem_to_hbm [thread:$0]  (%p1235_p3), %s1323_s16, 256, %s1328_s20, %s585_s12, %s1101_s27, %s1101_s27, %s1102_s29  }
 0x2e5 PF: > { %s1410_s15 = sld [smem:[#allocation17_spill]]  ;;  %s615_s28 = sand.u32 1, %s1069_s21  }
 0x2e6   : > { %s616_s11 = scalar_lea.sflag [#allocation4], %s615_s28 }
 0x2eb   : > { %p1411_p8 = scmp.ge.s32.totalorder %s1410_s15, 2 }
 0x2ed   : > { %p815_p2 = pnand %p1411_p8, %p1183_p6 }
 0x2ef   : > { %p816_p7 = pneg %p815_p2 }
 0x2f1   : > { %1064 = dma.done.wait (%p816_p7), %s616_s11, 256  }
 0x2f2   : > { %1066 = vsyncadd (%p816_p7), %s616_s11, 4294967040  ;;  %s26_s26 = sadd.s32 1, %s1410_s15   ;;  %s1412_s19 = sld [smem:[#allocation16_spill]] }
 0x2f3   : > { %p23_p9 = scmp.ge.s32.totalorder %s26_s26, 4   ;;  %s1413_s23 = sld [smem:[#allocation20_spill]] }
 0x2f4   : > { %s1414_s9 = sld [smem:[#allocation19_spill]]  ;;  %s1415_s21 = smov %s1073_s22 }
 0x2f5   : > { %s1417_s24 = smov %s1085_s25 }
 0x2f6   :  { %25 = sbr.rel (!%p23_p9) target bundleno = 13 (0xd), region = 110 }
 0x2f8   : > { %s1416_s22 = smov %s1412_s19 }
 0x2fa   : > { %s1418_s25 = smov %s1414_s9 }
 0x2fb   :  { %621 = vsyncpa [#allocation3], 1 }
 0x2fc   :  { %623 = vsyncpa [#allocation3 + $0x1], 1 }
 0x2fd   :  { %624 = vsyncpa [#allocation6], 1 }
 0x2fe   :  { %626 = vsyncpa [#allocation6 + $0x1], 1 }
 0x2ff   :  { %627 = vsyncpa [#allocation9], 1 }
 0x300   :  { %628 = vsyncpa [#allocation4], 1 }
 0x301   :  { %630 = vsyncpa [#allocation4 + $0x1], 1 }

</bundles_post_ra>
